<compile_context>
chip_gen: v7x
topology: tpu7x:2x2x1
jax: 0.10.0
libtpu: 0.0.40
codegen_flags: <defaults>
</compile_context>

<pallas_src>
import jax
import jax.numpy as jnp
from jax import lax
from jax.experimental import pallas as pl
from jax.experimental.pallas import tpu as pltpu

_LANE = 128
_SUBLANE = 8


def _round_up(x, m):
    return ((x + m - 1) // m) * m


def _pad2d(x, rows, cols):
    pr = rows - x.shape[0]
    pc = cols - x.shape[1]
    if pr == 0 and pc == 0:
        return x
    return jnp.pad(x, ((0, pr), (0, pc)))


def _item_net_kernel(user_ref, item_ref, w_ref, b_ref,
                     item_out_ref, result_ref, item_new_sc):
    # Grid = (item_tiles, user_tiles); user tiles are the inner axis so the
    # transformed item tile stays resident in `item_new_sc` across them.
    u = pl.program_id(1)

    @pl.when(u == 0)
    def _():
        # item_feat' = item_feat @ W.T + b.  Contract dim 1 of both operands
        # so the MXU consumes W directly in (out, in) layout (no transpose).
        item_new = lax.dot_general(
            item_ref[...], w_ref[...],
            dimension_numbers=(((1,), (1,)), ((), ())),
            preferred_element_type=jnp.float32,
        ) + b_ref[...]
        item_new_sc[...] = item_new
        item_out_ref[...] = item_new.astype(item_out_ref.dtype)

    # result = user_feat @ item_feat'.T, again as a contracting-dim matmul
    # (no in-kernel .T / XLU pass).
    result_ref[...] = lax.dot_general(
        user_ref[...], item_new_sc[...],
        dimension_numbers=(((1,), (1,)), ((), ())),
        preferred_element_type=jnp.float32,
    ).astype(result_ref.dtype)


def item_net_forward(user_feat, item_feat, W, b):
    """user_feat: (U, F), item_feat: (I, F), W: (F, F) [out, in], b: (F,)."""
    U, F = user_feat.shape
    I, F_i = item_feat.shape
    assert F_i == F and W.shape == (F, F) and b.shape == (F,)

    # Lane/sublane-friendly padded sizes and tile sizes.
    Fp = _round_up(F, _LANE)
    ti = _LANE                                   # item tile (lane dim of result)
    Ip = _round_up(I, ti)
    tu = min(_round_up(U, _SUBLANE), 128)        # user tile (sublane dim of result)
    Up = _round_up(U, tu)

    user_p = _pad2d(user_feat, Up, Fp)
    item_p = _pad2d(item_feat, Ip, Fp)
    w_p = _pad2d(W, Fp, Fp)                      # stays (out, in): no W.T materialized
    b_p = b if Fp == F else jnp.pad(b, (0, Fp - F))
    b_p = b_p.reshape(1, Fp)

    grid = (Ip // ti, Up // tu)

    # Advisory cost model for the XLA scheduler.
    cost = pl.CostEstimate(
        flops=2 * Ip * Fp * Fp + 2 * Up * Ip * Fp,
        transcendentals=0,
        bytes_accessed=4 * (Up * Fp + Ip * Fp + Fp * Fp + Fp + Ip * Fp + Up * Ip),
    )

    # VMEM budget: double-buffered blocks + resident scratch; clamp to 64 MiB
    # so the same kernel fits v7x (64 MiB/TC) as well as v5e/v6e (128 MiB).
    block_bytes = 4 * (tu * Fp + ti * Fp + Fp * Fp + Fp + ti * Fp + tu * ti + ti * Fp)
    vmem_limit = int(min(max(4 * block_bytes, 32 * 1024 * 1024), 64 * 1024 * 1024))

    item_out_p, result_p = pl.pallas_call(
        _item_net_kernel,
        out_shape=(
            jax.ShapeDtypeStruct((Ip, Fp), jnp.float32),
            jax.ShapeDtypeStruct((Up, Ip), jnp.float32),
        ),
        grid_spec=pltpu.PrefetchScalarGridSpec(
            num_scalar_prefetch=0,
            grid=grid,
            in_specs=[
                pl.BlockSpec((tu, Fp), lambda i, u: (u, 0)),   # user tile (streams, inner)
                pl.BlockSpec((ti, Fp), lambda i, u: (i, 0)),   # item tile (outer)
                pl.BlockSpec((Fp, Fp), lambda i, u: (0, 0)),   # W (grid-invariant)
                pl.BlockSpec((1, Fp), lambda i, u: (0, 0)),    # bias (grid-invariant)
            ],
            out_specs=(
                pl.BlockSpec((ti, Fp), lambda i, u: (i, 0)),   # item_out: one write per item tile
                pl.BlockSpec((tu, ti), lambda i, u: (u, i)),   # result tile (lane-dense)
            ),
            scratch_shapes=[pltpu.VMEM((ti, Fp), jnp.float32)],
        ),
        compiler_params=pltpu.CompilerParams(
            dimension_semantics=("parallel", "arbitrary"),
            vmem_limit_bytes=vmem_limit,
        ),
        cost_estimate=cost,
    )(user_p, item_p, w_p, b_p)

    # Strip padding back to the module's output shapes.
    return item_out_p[:I, :F], result_p[:U, :I]


if __name__ == "__main__":
    # Small shapes consistent with the module: n_feature hidden dim, a handful
    # of users/items.
    n_feature = 32
    n_users = 8
    n_items = 16

    key = jax.random.PRNGKey(0)
    k_u, k_i, k_w, k_b = jax.random.split(key, 4)

    user_feat = jax.random.normal(k_u, (n_users, n_feature), dtype=jnp.float32)
    item_feat = jax.random.normal(k_i, (n_items, n_feature), dtype=jnp.float32)

    # Deterministic Linear(n_feature, n_feature) parameters (PyTorch stores
    # weight as (out_features, in_features)).
    bound = 1.0 / (n_feature ** 0.5)
    W = jax.random.uniform(
        k_w, (n_feature, n_feature), minval=-bound, maxval=bound, dtype=jnp.float32
    )
    b = jax.random.uniform(
        k_b, (n_feature,), minval=-bound, maxval=bound, dtype=jnp.float32
    )

    item_out, result = item_net_forward(user_feat, item_feat, W, b)
    jax.block_until_ready((item_out, result))

    # Reference check in plain JAX (same math as the PyTorch module).
    item_ref = item_feat @ W.T + b
    result_ref = user_feat @ item_ref.T
    assert item_out.shape == (n_items, n_feature)
    assert result.shape == (n_users, n_items)
    assert jnp.allclose(item_out, item_ref, atol=1e-5, rtol=1e-5)
    assert jnp.allclose(result, result_ref, atol=1e-5, rtol=1e-5)

    print("KERNEL_OK")
</pallas_src>

<mosaic_0001>
module attributes {stable_mosaic.version = 11 : i64} {
  func.func @_item_net_kernel(%arg0: i32, %arg1: i32, %arg2: memref<8x128xf32, #tpu.memory_space<vmem>>, %arg3: memref<128x128xf32, #tpu.memory_space<vmem>>, %arg4: memref<128x128xf32, #tpu.memory_space<vmem>>, %arg5: memref<1x128xf32, #tpu.memory_space<vmem>>, %arg6: memref<128x128xf32, #tpu.memory_space<vmem>>, %arg7: memref<8x128xf32, #tpu.memory_space<vmem>>, %arg8: memref<128x128xf32, #tpu.memory_space<vmem>>) attributes {dimension_semantics = [#tpu.dimension_semantics<parallel>, #tpu.dimension_semantics<arbitrary>], iteration_bounds = array<i64: 1, 1>, scalar_prefetch = 0 : i64, scratch_operands = 1 : i64, tpu.core_type = #tpu.core_type<tc>, window_params = [{transform_indices = @transform_0, window_bounds = array<i64: 8, 128>}, {transform_indices = @transform_1, window_bounds = array<i64: 128, 128>}, {pipeline_mode = #tpu.pipeline_mode<synchronous>, transform_indices = @transform_2, window_bounds = array<i64: 128, 128>}, {pipeline_mode = #tpu.pipeline_mode<synchronous>, transform_indices = @transform_3, window_bounds = array<i64: 1, 128>}, {transform_indices = @transform_4, window_bounds = array<i64: 128, 128>}, {transform_indices = @transform_5, window_bounds = array<i64: 8, 128>}]} {
    %c0_i32 = arith.constant 0 : i32
    %0 = arith.cmpi eq, %arg1, %c0_i32 : i32
    %1 = arith.extui %0 : i1 to i32
    %c0_i32_0 = arith.constant 0 : i32
    %2 = arith.cmpi ne, %1, %c0_i32_0 : i32
    scf.if %2 {
      %c0_6 = arith.constant 0 : index
      %c0_7 = arith.constant 0 : index
      %7 = vector.load %arg3[%c0_6, %c0_7] : memref<128x128xf32, #tpu.memory_space<vmem>>, vector<128x128xf32>
      %c0_8 = arith.constant 0 : index
      %c0_9 = arith.constant 0 : index
      %8 = vector.load %arg4[%c0_8, %c0_9] : memref<128x128xf32, #tpu.memory_space<vmem>>, vector<128x128xf32>
      %cst_10 = arith.constant dense<0.000000e+00> : vector<128x128xf32>
      %9 = tpu.matmul %7, %8, %cst_10 {dimension_numbers = #tpu.dot_dimension_numbers<[1], [1], [0], [0], [0, 0, 1, 0], [], []>} : vector<128x128xf32>, vector<128x128xf32>, vector<128x128xf32> -> vector<128x128xf32>
      %c0_11 = arith.constant 0 : index
      %c0_12 = arith.constant 0 : index
      %10 = vector.load %arg5[%c0_11, %c0_12] : memref<1x128xf32, #tpu.memory_space<vmem>>, vector<1x128xf32>
      %11 = vector.broadcast %10 : vector<1x128xf32> to vector<128x128xf32>
      %12 = arith.addf %9, %11 : vector<128x128xf32>
      %c0_13 = arith.constant 0 : index
      %c0_14 = arith.constant 0 : index
      %13 = vector.load %arg8[%c0_13, %c0_14] : memref<128x128xf32, #tpu.memory_space<vmem>>, vector<128x128xf32>
      tpu.vector_store %arg8[%c0_13, %c0_14], %12 {strides = array<i32>} : memref<128x128xf32, #tpu.memory_space<vmem>>, vector<128x128xf32>,
      %c0_15 = arith.constant 0 : index
      %c0_16 = arith.constant 0 : index
      %14 = vector.load %arg6[%c0_15, %c0_16] : memref<128x128xf32, #tpu.memory_space<vmem>>, vector<128x128xf32>
      tpu.vector_store %arg6[%c0_15, %c0_16], %12 {strides = array<i32>} : memref<128x128xf32, #tpu.memory_space<vmem>>, vector<128x128xf32>,
    } else {
    }
    %c0 = arith.constant 0 : index
    %c0_1 = arith.constant 0 : index
    %3 = vector.load %arg2[%c0, %c0_1] : memref<8x128xf32, #tpu.memory_space<vmem>>, vector<8x128xf32>
    %c0_2 = arith.constant 0 : index
    %c0_3 = arith.constant 0 : index
    %4 = vector.load %arg8[%c0_2, %c0_3] : memref<128x128xf32, #tpu.memory_space<vmem>>, vector<128x128xf32>
    %cst = arith.constant dense<0.000000e+00> : vector<8x128xf32>
    %5 = tpu.matmul %3, %4, %cst {dimension_numbers = #tpu.dot_dimension_numbers<[1], [1], [0], [0], [0, 0, 1, 0], [], []>} : vector<8x128xf32>, vector<128x128xf32>, vector<8x128xf32> -> vector<8x128xf32>
    %c0_4 = arith.constant 0 : index
    %c0_5 = arith.constant 0 : index
    %6 = vector.load %arg7[%c0_4, %c0_5] : memref<8x128xf32, #tpu.memory_space<vmem>>, vector<8x128xf32>
    tpu.vector_store %arg7[%c0_4, %c0_5], %5 {strides = array<i32>} : memref<8x128xf32, #tpu.memory_space<vmem>>, vector<8x128xf32>,
    return
  }
  func.func @transform_0(%arg0: i32, %arg1: i32) -> (i32, i32) {
    %c0_i32 = arith.constant 0 : i32
    %c0_i32_0 = arith.constant 0 : i32
    return %arg1, %c0_i32 : i32, i32
  }
  func.func @transform_1(%arg0: i32, %arg1: i32) -> (i32, i32) {
    %c0_i32 = arith.constant 0 : i32
    %c0_i32_0 = arith.constant 0 : i32
    return %arg0, %c0_i32 : i32, i32
  }
  func.func @transform_2(%arg0: i32, %arg1: i32) -> (i32, i32) {
    %c0_i32 = arith.constant 0 : i32
    %c0_i32_0 = arith.constant 0 : i32
    %c0_i32_1 = arith.constant 0 : i32
    return %c0_i32, %c0_i32_0 : i32, i32
  }
  func.func @transform_3(%arg0: i32, %arg1: i32) -> (i32, i32) {
    %c0_i32 = arith.constant 0 : i32
    %c0_i32_0 = arith.constant 0 : i32
    %c0_i32_1 = arith.constant 0 : i32
    return %c0_i32, %c0_i32_0 : i32, i32
  }
  func.func @transform_4(%arg0: i32, %arg1: i32) -> (i32, i32) {
    %c0_i32 = arith.constant 0 : i32
    %c0_i32_0 = arith.constant 0 : i32
    return %arg0, %c0_i32 : i32, i32
  }
  func.func @transform_5(%arg0: i32, %arg1: i32) -> (i32, i32) {
    %c0_i32 = arith.constant 0 : i32
    return %arg1, %arg0 : i32, i32
  }
}

</mosaic_0001>

<bundles_post_ra>
// kernel: tpu_custom_call.1
= control target key start
LH: loop header
LB: loop body
LE: loop exit
PB: predicated region body
PF: predicated region fallthrough
CT: control target
= control target key end

     0   :  { %11 = vsyncpa [#allocation4], 0  ;;  %s845_s0 = inlined_call_operand.hbm [shape: f32[8,128], index: 0, kind: input, shape index: {}]   ;;  %s846_s1 = inlined_call_operand.hbm [shape: f32[128,128], index: 1, kind: input, shape index: {}]   ;;  %s847_s2 = inlined_call_operand.hbm [shape: f32[128,128], index: 2, kind: input, shape index: {}]   ;;  %s848_s3 = inlined_call_operand.vmem [shape: f32[1,128], index: 3, kind: input, shape index: {}]   ;;  %s849_s4 = inlined_call_operand.hbm [shape: f32[128,128], index: 4, kind: output, shape index: {0}]   ;;  %s850_s5 = inlined_call_operand.hbm [shape: f32[8,128], index: 5, kind: output, shape index: {1}]  }
   0x1   :  { %12 = vsyncpa [#allocation7], 0 }
   0x2   :  { %13 = vsyncpa [#allocation5], 0 }
   0x3   :  { %14 = vsyncpa [#allocation11], 0  ;;  %s725_s18 = smov [#allocation6]   ;;  %s607_s22 = scalar_lea.hbm %s846_s1, 2048 }
   0x4   :  { %s30_s19 = sshll.u32 %s725_s18, 4  ;;  %p608_p0 = scmp.ne.s32.totalorder %s846_s1, %s607_s22  ;;  %s31_s19 = int_to_ptr.vmem [resolvable:$true] %s30_s19 }
   0x5   :  { %p611_p1 = scmp.lt.u32.totalorder %s607_s22, %s846_s1 }
   0x7   :  { %p613_p2 = pnand %p611_p1, %p608_p0 }
   0x9   :  { %616 = shalt.err (!%p613_p2)
}
   0xa   :  { %s617_s27 = scalar_lea.vmem %s31_s19, 2048  ;;  %p622_p4 = scmp.lt.s32.totalorder %s31_s19, %s31_s19 }
   0xb   :  { %p618_p3 = scmp.ne.s32.totalorder %s31_s19, %s617_s27  ;;  %p623_p5 = scmp.lt.s32.totalorder %s617_s27, %s617_s27 }
   0xd   :  { %p624_p6 = por %p623_p5, %p622_p4 }
   0xf   :  { %p625_p7 = pnand %p624_p6, %p618_p3 }
  0x11   :  { %628 = shalt.err (!%p625_p7)
}
  0x12   :  { %s726_s28 = smov 128   ;;  %s727_s29 = smov 8  }
  0x13   :  { %36 = dma.hbm_to_vmem [thread:$0]  %s846_s1, 2048, %s31_s19, [#allocation7], %s726_s28, %s726_s28, %s727_s29  }
  0x14   :  { %s728_s7 = smov [#allocation3]   ;;  %s729_s9 = smov [#allocation8]  }
  0x15   :  { %s21_s8 = sshll.u32 %s728_s7, 4  ;;  %s42_s10 = sshll.u32 %s729_s9, 4  ;;  %s22_s8 = int_to_ptr.vmem [resolvable:$true] %s21_s8  ;;  %s43_s10 = int_to_ptr.vmem [resolvable:$true] %s42_s10 }
  0x16   :  { %s629_s13 = scalar_lea.hbm %s845_s0, 128 }
  0x17   :  { %p630_p8 = scmp.ne.s32.totalorder %s845_s0, %s629_s13  ;;  %p633_p9 = scmp.lt.u32.totalorder %s629_s13, %s845_s0 }
  0x19   :  { %p635_p10 = pnand %p633_p9, %p630_p8 }
  0x1b   :  { %638 = shalt.err (!%p635_p10)
}
  0x1c   :  { %s639_s1 = scalar_lea.vmem %s22_s8, 128  ;;  %p644_p12 = scmp.lt.s32.totalorder %s22_s8, %s22_s8 }
  0x1d   :  { %p640_p11 = scmp.ne.s32.totalorder %s22_s8, %s639_s1  ;;  %p645_p13 = scmp.lt.s32.totalorder %s639_s1, %s639_s1 }
  0x1f   :  { %p646_p0 = por %p645_p13, %p644_p12 }
  0x21   :  { %p647_p1 = pnand %p646_p0, %p640_p11 }
  0x23   :  { %650 = shalt.err (!%p647_p1)
}
  0x24   :  { %24 = dma.hbm_to_vmem [thread:$0]  %s845_s0, 128, %s22_s8, [#allocation4]  }
  0x25   :  { %s651_s22 = scalar_lea.hbm %s847_s2, 2048 }
  0x26   :  { %p652_p2 = scmp.ne.s32.totalorder %s847_s2, %s651_s22  ;;  %p655_p3 = scmp.lt.u32.totalorder %s651_s22, %s847_s2 }
  0x28   :  { %p657_p4 = pnand %p655_p3, %p652_p2 }
  0x2a   :  { %660 = shalt.err (!%p657_p4)
}
  0x2b   :  { %s661_s27 = scalar_lea.vmem %s43_s10, 2048  ;;  %p666_p6 = scmp.lt.s32.totalorder %s43_s10, %s43_s10 }
  0x2c   :  { %p662_p5 = scmp.ne.s32.totalorder %s43_s10, %s661_s27  ;;  %p667_p7 = scmp.lt.s32.totalorder %s661_s27, %s661_s27 }
  0x2e   :  { %p668_p8 = por %p667_p7, %p666_p6 }
  0x30   :  { %p669_p9 = pnand %p668_p8, %p662_p5 }
  0x32   :  { %672 = shalt.err (!%p669_p9)
}
  0x33   :  { %48 = dma.hbm_to_vmem [thread:$0]  %s847_s2, 2048, %s43_s10, [#allocation7], %s726_s28, %s726_s28, %s727_s29  }
  0x34   :  { %717 = dma.done.wait [#allocation4], 128  }
  0x35   :  { %718 = vsyncadd [#allocation4], 4294967168 }
  0x36   :  { %719 = dma.done.wait [#allocation7], 4096  }
  0x37   :  { %720 = vsyncadd [#allocation7], 4294963200  ;;  %v80_v0 = vld [vmem:[#allocation8] sm:$0xff]  ;;  %v81_v1 = vld [vmem:[#allocation8 + $0x8] sm:$0xff]  ;;  %v730_v40 = vmov 0.0|0.0   ;;  %vm731_vm0 = vmmov 0  }
  0x38   :  { %v82_v2 = vld [vmem:[#allocation8 + $0x10] sm:$0xff]  ;;  %v541_v3 = vpack.c.bf16 %v81_v1, %v80_v0  ;;  %v83_v4 = vld [vmem:[#allocation8 + $0x18] sm:$0xff]  ;;  %v64_v6 = vld [vmem:[#allocation6] sm:$0xff]  ;;  %573 = vmatprep.subr.bf16.mxu1 %v730_v40  ;;  %v732_v41 = vmov 0.0  }
  0x39   :  { %v545_v5 = vpack.c.bf16 %v83_v4, %v82_v2  ;;  %v84_v7 = vld [vmem:[#allocation8 + $0x20] sm:$0xff]  ;;  %v85_v8 = vld [vmem:[#allocation8 + $0x28] sm:$0xff]  ;;  %482 = vmatprep.mubr.f32.mxu0 %v64_v6  ;;  %v86_v10 = vld [vmem:[#allocation8 + $0x30] sm:$0xff]  ;;  %538 = vmatprep.mubr.msk.f32.mxu1 %vm731_vm0, %v732_v41 }
  0x3a   :  { %542 = vmatprep.subr.bf16.mxu0 %v541_v3  ;;  %v549_v9 = vpack.c.bf16 %v85_v8, %v84_v7  ;;  %v87_v11 = vld [vmem:[#allocation8 + $0x38] sm:$0xff]  ;;  %v88_v13 = vld [vmem:[#allocation8 + $0x40] sm:$0xff]  ;;  %v89_v14 = vld [vmem:[#allocation8 + $0x48] sm:$0xff] }
  0x3b   :  { %544 = vmatpush3.bf16.xpose.msra.mxu0 %v541_v3  ;;  %v553_v12 = vpack.c.bf16 %v87_v11, %v86_v10  ;;  %v557_v15 = vpack.c.bf16 %v89_v14, %v88_v13  ;;  %v90_v16 = vld [vmem:[#allocation8 + $0x50] sm:$0xff]  ;;  %v91_v17 = vld [vmem:[#allocation8 + $0x58] sm:$0xff]  ;;  %v92_v19 = vld [vmem:[#allocation8 + $0x60] sm:$0xff] }
  0x3c   :  { %546 = vmatprep.subr.bf16.mxu0 %v545_v5  ;;  %v561_v18 = vpack.c.bf16 %v91_v17, %v90_v16  ;;  %v93_v20 = vld [vmem:[#allocation8 + $0x68] sm:$0xff]  ;;  %v94_v22 = vld [vmem:[#allocation8 + $0x70] sm:$0xff]  ;;  %v95_v23 = vld [vmem:[#allocation8 + $0x78] sm:$0xff] }
  0x3d   :  { %v565_v21 = vpack.c.bf16 %v93_v20, %v92_v19  ;;  %v569_v24 = vpack.c.bf16 %v95_v23, %v94_v22  ;;  %v65_v25 = vld [vmem:[#allocation6 + $0x8] sm:$0xff]  ;;  %v66_v26 = vld [vmem:[#allocation6 + $0x10] sm:$0xff]  ;;  %v67_v27 = vld [vmem:[#allocation6 + $0x18] sm:$0xff] }
  0x3e   :  { %v68_v28 = vld [vmem:[#allocation6 + $0x20] sm:$0xff]  ;;  %v69_v29 = vld [vmem:[#allocation6 + $0x28] sm:$0xff]  ;;  %v70_v30 = vld [vmem:[#allocation6 + $0x30] sm:$0xff] }
  0x3f   :  { %v71_v31 = vld [vmem:[#allocation6 + $0x38] sm:$0xff]  ;;  %v72_v32 = vld [vmem:[#allocation6 + $0x40] sm:$0xff]  ;;  %v73_v33 = vld [vmem:[#allocation6 + $0x48] sm:$0xff] }
  0x40   :  { %v74_v34 = vld [vmem:[#allocation6 + $0x50] sm:$0xff]  ;;  %v75_v35 = vld [vmem:[#allocation6 + $0x58] sm:$0xff]  ;;  %v76_v36 = vld [vmem:[#allocation6 + $0x60] sm:$0xff] }
  0x41   :  { %v77_v37 = vld [vmem:[#allocation6 + $0x68] sm:$0xff]  ;;  %v78_v38 = vld [vmem:[#allocation6 + $0x70] sm:$0xff]  ;;  %v79_v39 = vld [vmem:[#allocation6 + $0x78] sm:$0xff] }
  0x42   :  { %v400_v42 = vld [vmem:[%s848_s3] ss:$0 sm:$0xff]  ;;  %s733_s3 = smov [#allocation9]  }
  0x43   :  { %548 = vmatpush3.bf16.xpose.msra.mxu0 %v545_v5  ;;  %v280_v19 = vld [vmem:[#allocation3] sm:$0xff]  ;;  %s373_s7 = sshll.u32 %s733_s3, 4  ;;  %s374_s7 = int_to_ptr.vmem [resolvable:$true] %s373_s7 }
  0x44   :  { %550 = vmatprep.subr.bf16.mxu0 %v549_v9  ;;  %s673_s8 = scalar_lea.vmem %s374_s7, 2048  ;;  %p678_p11 = scmp.lt.s32.totalorder %s374_s7, %s374_s7 }
  0x45   :  { %p674_p10 = scmp.ne.s32.totalorder %s374_s7, %s673_s8  ;;  %p679_p12 = scmp.lt.s32.totalorder %s673_s8, %s673_s8 }
  0x47   :  { %p680_p13 = por %p679_p12, %p678_p11 }
  0x49   :  { %p681_p0 = pnand %p680_p13, %p674_p10 }
  0x4b   :  { %552 = vmatpush3.bf16.xpose.msra.mxu0 %v549_v9 }
  0x4c   :  { %554 = vmatprep.subr.bf16.mxu0 %v553_v12 }
  0x53   :  { %556 = vmatpush3.bf16.xpose.msra.mxu0 %v553_v12 }
  0x54   :  { %558 = vmatprep.subr.bf16.mxu0 %v557_v15 }
  0x5b   :  { %560 = vmatpush3.bf16.xpose.msra.mxu0 %v557_v15 }
  0x5c   :  { %562 = vmatprep.subr.bf16.mxu0 %v561_v18 }
  0x63   :  { %564 = vmatpush3.bf16.xpose.msra.mxu0 %v561_v18 }
  0x64   :  { %566 = vmatprep.subr.bf16.mxu0 %v565_v21 }
  0x6b   :  { %568 = vmatpush3.bf16.xpose.msra.mxu0 %v565_v21 }
  0x6c   :  { %570 = vmatprep.subr.bf16.mxu0 %v569_v24 }
  0x73   :  { %572 = vmatpush3.bf16.xpose.msra.mxu0 %v569_v24 }
  0x7a   :  { %483 = vmatmul.mubr.f32.vlgmr.msra.gmra.mrb[0].mxu0 %v65_v25 }
  0x7b   :  { %485 = vmatprep.mubr.f32.mxu0 %v66_v26 }
  0x7e   :  { %486 = vmatmul.mubr.f32.gmra.mrb[2].mxu0 %v67_v27 }
  0x7f   :  { %488 = vmatprep.mubr.f32.mxu0 %v68_v28 }
  0x82   :  { %489 = vmatmul.mubr.f32.gmra.mrb[4].mxu0 %v69_v29 }
  0x83   :  { %491 = vmatprep.mubr.f32.mxu0 %v70_v30 }
  0x86   :  { %492 = vmatmul.mubr.f32.gmra.mrb[6].mxu0 %v71_v31 }
  0x87   :  { %494 = vmatprep.mubr.f32.mxu0 %v72_v32 }
  0x8a   :  { %495 = vmatmul.mubr.f32.gmra.mrb[8].mxu0 %v73_v33 }
  0x8b   :  { %497 = vmatprep.mubr.f32.mxu0 %v74_v34 }
  0x8e   :  { %498 = vmatmul.mubr.f32.gmra.mrb[10].mxu0 %v75_v35 }
  0x8f   :  { %500 = vmatprep.mubr.f32.mxu0 %v76_v36 }
  0x92   :  { %501 = vmatmul.mubr.f32.gmra.mrb[12].mxu0 %v77_v37 }
  0x93   :  { %503 = vmatprep.mubr.f32.mxu0 %v78_v38 }
  0x96   :  { %504 = vmatmul.mubr.f32.gmra.mrb[14].mxu0 %v79_v39 }
 0x14d   :  { %v484_v43 = vpop.f32.mrb[0].mxu0 }
 0x14e   :  { %v175_v44 = vadd.f32 %v484_v43, %v400_v42  ;;  %v169_v45 = vpop.f32.mrb[1].mxu0 }
 0x14f   :  { %v170_v46 = vadd.f32 %v400_v42, %v169_v45 }
 0x150   :  { %265 = vst [vmem:[#allocation9 + $0x8] sm:$0xff] %v175_v44 }
 0x151   :  { %264 = vst [vmem:[#allocation9] sm:$0xff] %v170_v46  ;;  %v574_v47 = vpack.c.bf16 %v175_v44, %v170_v46  ;;  %v487_v48 = vpop.f32.mrb[2].mxu0 }
 0x152   :  { %v185_v49 = vadd.f32 %v487_v48, %v400_v42  ;;  %v179_v50 = vpop.f32.mrb[3].mxu0 }
 0x153   :  { %575 = vmatpush3.bf16.xpose.msra.mxu1 %v574_v47  ;;  %v180_v51 = vadd.f32 %v400_v42, %v179_v50 }
 0x154   :  { %267 = vst [vmem:[#allocation9 + $0x18] sm:$0xff] %v185_v49  ;;  %576 = vmatprep.subr.bf16.mxu1 %v730_v40 }
 0x155   :  { %266 = vst [vmem:[#allocation9 + $0x10] sm:$0xff] %v180_v51  ;;  %v577_v52 = vpack.c.bf16 %v185_v49, %v180_v51  ;;  %v490_v53 = vpop.f32.mrb[4].mxu0 }
 0x156   :  { %v195_v54 = vadd.f32 %v490_v53, %v400_v42  ;;  %v189_v55 = vpop.f32.mrb[5].mxu0 }
 0x157   :  { %v190_v56 = vadd.f32 %v400_v42, %v189_v55 }
 0x158   :  { %269 = vst [vmem:[#allocation9 + $0x28] sm:$0xff] %v195_v54 }
 0x159   :  { %268 = vst [vmem:[#allocation9 + $0x20] sm:$0xff] %v190_v56  ;;  %v580_v57 = vpack.c.bf16 %v195_v54, %v190_v56  ;;  %v493_v58 = vpop.f32.mrb[6].mxu0 }
 0x15a   :  { %v205_v59 = vadd.f32 %v493_v58, %v400_v42  ;;  %v199_v60 = vpop.f32.mrb[7].mxu0 }
 0x15b   :  { %578 = vmatpush3.bf16.xpose.msra.mxu1 %v577_v52  ;;  %v200_v61 = vadd.f32 %v400_v42, %v199_v60 }
 0x15c   :  { %579 = vmatprep.subr.bf16.mxu1 %v730_v40  ;;  %271 = vst [vmem:[#allocation9 + $0x38] sm:$0xff] %v205_v59 }
 0x15d   :  { %270 = vst [vmem:[#allocation9 + $0x30] sm:$0xff] %v200_v61  ;;  %v583_v62 = vpack.c.bf16 %v205_v59, %v200_v61  ;;  %v496_v63 = vpop.f32.mrb[8].mxu0 }
 0x15e   :  { %v215_v0 = vadd.f32 %v496_v63, %v400_v42  ;;  %v209_v1 = vpop.f32.mrb[9].mxu0 }
 0x15f   :  { %v210_v2 = vadd.f32 %v400_v42, %v209_v1 }
 0x160   :  { %273 = vst [vmem:[#allocation9 + $0x48] sm:$0xff] %v215_v0 }
 0x161   :  { %272 = vst [vmem:[#allocation9 + $0x40] sm:$0xff] %v210_v2  ;;  %v586_v3 = vpack.c.bf16 %v215_v0, %v210_v2  ;;  %v499_v4 = vpop.f32.mrb[10].mxu0 }
 0x162   :  { %v225_v5 = vadd.f32 %v499_v4, %v400_v42  ;;  %v219_v6 = vpop.f32.mrb[11].mxu0 }
 0x163   :  { %581 = vmatpush3.bf16.xpose.msra.mxu1 %v580_v57  ;;  %v220_v7 = vadd.f32 %v400_v42, %v219_v6 }
 0x164   :  { %582 = vmatprep.subr.bf16.mxu1 %v730_v40  ;;  %275 = vst [vmem:[#allocation9 + $0x58] sm:$0xff] %v225_v5 }
 0x165   :  { %274 = vst [vmem:[#allocation9 + $0x50] sm:$0xff] %v220_v7  ;;  %v589_v8 = vpack.c.bf16 %v225_v5, %v220_v7  ;;  %v502_v9 = vpop.f32.mrb[12].mxu0 }
 0x166   :  { %v235_v10 = vadd.f32 %v502_v9, %v400_v42  ;;  %v229_v11 = vpop.f32.mrb[13].mxu0 }
 0x167   :  { %v230_v12 = vadd.f32 %v400_v42, %v229_v11 }
 0x168   :  { %277 = vst [vmem:[#allocation9 + $0x68] sm:$0xff] %v235_v10 }
 0x169   :  { %276 = vst [vmem:[#allocation9 + $0x60] sm:$0xff] %v230_v12  ;;  %v592_v13 = vpack.c.bf16 %v235_v10, %v230_v12  ;;  %v505_v14 = vpop.f32.mrb[14].mxu0 }
 0x16a   :  { %v245_v15 = vadd.f32 %v505_v14, %v400_v42  ;;  %v239_v16 = vpop.f32.mrb[15].mxu0 }
 0x16b   :  { %584 = vmatpush3.bf16.xpose.msra.mxu1 %v583_v62  ;;  %v240_v17 = vadd.f32 %v400_v42, %v239_v16 }
 0x16c   :  { %585 = vmatprep.subr.bf16.mxu1 %v730_v40  ;;  %279 = vst [vmem:[#allocation9 + $0x78] sm:$0xff] %v245_v15 }
 0x16d   :  { %278 = vst [vmem:[#allocation9 + $0x70] sm:$0xff] %v240_v17  ;;  %v595_v18 = vpack.c.bf16 %v245_v15, %v240_v17 }
 0x173   :  { %587 = vmatpush3.bf16.xpose.msra.mxu1 %v586_v3 }
 0x174   :  { %588 = vmatprep.subr.bf16.mxu1 %v730_v40 }
 0x17b   :  { %590 = vmatpush3.bf16.xpose.msra.mxu1 %v589_v8 }
 0x17c   :  { %591 = vmatprep.subr.bf16.mxu1 %v730_v40 }
 0x183   :  { %593 = vmatpush3.bf16.xpose.msra.mxu1 %v592_v13 }
 0x184   :  { %594 = vmatprep.subr.bf16.mxu1 %v730_v40 }
 0x18b   :  { %596 = vmatpush3.bf16.xpose.msra.mxu1 %v595_v18 }
 0x192   :  { %539 = vmatmul.mubr.f32.vlgmr.msra.gmra.mrb[0].mxu1 %v280_v19 }
 0x193   :  { %684 = shalt.err (!%p681_p0)
}
 0x194   :  { %s685_s11 = scalar_lea.hbm %s849_s4, 2048 }
 0x195   :  { %p686_p1 = scmp.ne.s32.totalorder %s849_s4, %s685_s11  ;;  %p689_p2 = scmp.lt.u32.totalorder %s685_s11, %s849_s4 }
 0x197   :  { %p691_p3 = pnand %p689_p2, %p686_p1 }
 0x199   :  { %694 = shalt.err (!%p691_p3)
}
 0x19a   :  { %379 = dma.vmem_to_hbm [thread:$0]  %s374_s7, 2048, %s849_s4, [#allocation5], %s726_s28, %s726_s28, %s727_s29  }
 0x19b   :  { %s734_s1 = smov [#allocation10]  }
 0x19c   :  { %s386_s18 = sshll.u32 %s734_s1, 4  ;;  %s387_s18 = int_to_ptr.vmem [resolvable:$true] %s386_s18 }
 0x19d   :  { %s695_s19 = scalar_lea.vmem %s387_s18, 128  ;;  %p700_p5 = scmp.lt.s32.totalorder %s387_s18, %s387_s18 }
 0x19e   :  { %p696_p4 = scmp.ne.s32.totalorder %s387_s18, %s695_s19  ;;  %p701_p6 = scmp.lt.s32.totalorder %s695_s19, %s695_s19 }
 0x1a0   :  { %p702_p7 = por %p701_p6, %p700_p5 }
 0x1a2   :  { %p703_p8 = pnand %p702_p7, %p696_p4 }
 0x265   :  { %v363_v20 = vpop.f32.mrb[0].mxu1 }
 0x266   :  { %367 = vst [vmem:[#allocation10] sm:$0xff] %v363_v20  ;;  %v540_v21 = vpop.f32.mrb[1].mxu1 }
 0x267   :  { %706 = shalt.err (!%p703_p8)
}
 0x268   :  { %s707_s22 = scalar_lea.hbm %s850_s5, 128 }
 0x269   :  { %p708_p9 = scmp.ne.s32.totalorder %s850_s5, %s707_s22  ;;  %p711_p10 = scmp.lt.u32.totalorder %s707_s22, %s850_s5 }
 0x26b   :  { %p713_p11 = pnand %p711_p10, %p708_p9 }
 0x26d   :  { %716 = shalt.err (!%p713_p11)
}
 0x26e   :  { %389 = dma.vmem_to_hbm [thread:$0]  %s387_s18, 128, %s850_s5, [#allocation11]  }
 0x26f   :  { %721 = dma.done.wait [#allocation5], 2048  }
 0x270   :  { %722 = vsyncadd [#allocation5], 4294965248 }
 0x271   :  { %723 = dma.done.wait [#allocation11], 128  }
 0x272   :  { %724 = vsyncadd [#allocation11], 4294967168 }
 0x273   :  { %396 = vsyncpa [#allocation4], 1 }
 0x274   :  { %397 = vsyncpa [#allocation7], 1 }
 0x275   :  { %398 = vsyncpa [#allocation5], 1 }
 0x276   :  { %399 = vsyncpa [#allocation11], 1 }

</bundles_post_ra>
